<compile_context>
chip_gen: v5e
topology: v5e:2x2
jax: 0.10.0
libtpu: 0.0.40
codegen_flags: <defaults>
</compile_context>

<pallas_src>
import jax
import jax.numpy as jnp
from jax import lax
from jax.experimental import pallas as pl
from jax.experimental.pallas import tpu as pltpu

_H1 = 32            # first MLP width
_H2 = 16            # second MLP width
_H1A = _H1 + 1      # + fused wide row


def _round_up(n, m):
    return ((n + m - 1) // m) * m


def _widedeep_kernel(x_ref, w1a_t_ref, t1a_t_ref, w2_t_ref, t2_t_ref, w3_t_ref,
                     out_ref):
    # x_ref: (tb, D).  All weight refs are whole-array blocks with constant
    # index_map, i.e. resident in VMEM for the whole grid.
    x = x_ref[...]

    # Layer 1 + wide path in a single MXU pass, feature-major output:
    # a1[h, b] = sum_d w1a_t[h, d] * x[b, d]    -> (33, tb), f32 accumulation.
    a1 = lax.dot_general(
        w1a_t_ref[...], x, (((1,), (1,)), ((), ())),
        preferred_element_type=jnp.float32) + t1a_t_ref[...]

    h1 = jnp.maximum(a1[:_H1, :], 0.0)        # (32, tb)  ReLU on the deep rows only
    wide = a1[_H1:_H1 + 1, :]                 # (1, tb)   x @ wl + bl + b3 (no ReLU)

    # Layer 2 (Dropout is identity at inference -> nothing to do).
    a2 = jnp.dot(w2_t_ref[...], h1, preferred_element_type=jnp.float32) + t2_t_ref[...]
    h2 = jnp.maximum(a2, 0.0)                 # (16, tb)

    # Output layer + wide logit, sigmoid, lane-dense (1, tb) store.
    a3 = jnp.dot(w3_t_ref[...], h2, preferred_element_type=jnp.float32) + wide
    out_ref[...] = jax.nn.sigmoid(a3)


def _fold_params(params):
    """Fold BN(inference) + biases into (weight, shift) pairs, fuse the wide
    path into layer 1, and pre-transpose everything for feature-major compute."""
    (w1, b1, s1, t1, w2, b2, s2, t2, w3, b3, wl, bl) = params

    w1f = w1 * s1               # (D, 32)
    t1f = b1 * s1 + t1          # (1, 32)
    w2f = w2 * s2               # (32, 16)
    t2f = b2 * s2 + t2          # (1, 16)

    # Layer-1 augmented with the wide column, then transposed; bl + b3 folded
    # into the wide row's shift.
    w1a_t = jnp.concatenate([w1f, wl], axis=1).T            # (33, D)
    t1a_t = jnp.concatenate([t1f, bl + b3], axis=1).T       # (33, 1)

    w2_t = w2f.T                                            # (16, 32)
    t2_t = t2f.T                                            # (16, 1)
    w3_t = w3.T                                             # (1, 16)
    return w1a_t, t1a_t, w2_t, t2_t, w3_t


def _pick_tile(batch, block_b):
    """Batch-tile: big enough to amortize per-step overhead, >=2 blocks when the
    batch allows (v7x megacore), and always satisfying the (8,128) BlockSpec
    divisibility rules (each block dim divides the tile grain or equals the
    full array dim)."""
    block_b = max(128, _round_up(block_b, 128))
    if batch > block_b:
        return block_b                                   # >= 2 blocks automatically
    if batch >= 2048:
        return _round_up(pl.cdiv(batch, 2), 128)         # exactly 2 blocks
    return batch                                         # single full-batch block


def widedeep_forward(x, params, *, block_b=4096):
    """x: (B, ...) flattened to (B, D) like torch's reshape. Returns (B, 1) float32."""
    B = x.shape[0]
    x2d = x.reshape(B, -1)
    # Keep x in its upstream dtype when it is already f32 / bf16: a wrapper-side
    # cast would add a full extra HBM read+write for a memory-bound kernel.
    if x2d.dtype not in (jnp.float32, jnp.bfloat16):
        x2d = x2d.astype(jnp.float32)
    D = x2d.shape[1]

    w1a_t, t1a_t, w2_t, t2_t, w3_t = _fold_params(params)
    w1a_t = w1a_t.astype(x2d.dtype)      # only the big matmul operand matches x

    tb = _pick_tile(B, block_b)
    num_blocks = pl.cdiv(B, tb)          # ragged last block handled by Pallas

    const = lambda i: (0, 0)
    cost = pl.CostEstimate(
        flops=2 * B * (D * _H1A + _H1 * _H2 + _H2),
        transcendentals=B,                                    # one sigmoid per row
        bytes_accessed=B * D * x2d.dtype.itemsize + B * 4
        + w1a_t.size * w1a_t.dtype.itemsize
        + 4 * (t1a_t.size + w2_t.size + t2_t.size + w3_t.size),
    )

    out = pl.pallas_call(
        _widedeep_kernel,
        out_shape=jax.ShapeDtypeStruct((1, B), jnp.float32),
        grid=(num_blocks,),
        in_specs=[
            pl.BlockSpec((tb, D), lambda i: (i, 0)),      # x: tiled over batch
            pl.BlockSpec((_H1A, D), const),               # W1a^T (resident)
            pl.BlockSpec((_H1A, 1), const),               # T1a^T
            pl.BlockSpec((_H2, _H1), const),              # W2^T
            pl.BlockSpec((_H2, 1), const),                # T2^T
            pl.BlockSpec((1, _H2), const),                # W3^T
        ],
        out_specs=pl.BlockSpec((1, tb), lambda i: (0, i)),    # lane-dense output
        compiler_params=pltpu.CompilerParams(
            dimension_semantics=("parallel",),            # megacore sharding on v7x
        ),
        cost_estimate=cost,
    )(x2d, w1a_t, t1a_t, w2_t, t2_t, w3_t)
    return out.reshape(B, 1)


def init_params(key, input_dim):
    """Deterministic synthetic parameters matching nn.Linear / BatchNorm1d shapes."""
    ks = jax.random.split(key, 16)

    def linear(kw, kb, fan_in, fan_out):
        bound = 1.0 / jnp.sqrt(fan_in)
        w = jax.random.uniform(kw, (fan_in, fan_out), jnp.float32, -bound, bound)
        b = jax.random.uniform(kb, (1, fan_out), jnp.float32, -bound, bound)
        return w, b

    w1, b1 = linear(ks[0], ks[1], input_dim, _H1)
    w2, b2 = linear(ks[2], ks[3], _H1, _H2)
    w3, b3 = linear(ks[4], ks[5], _H2, 1)
    wl, bl = linear(ks[6], ks[7], input_dim, 1)

    def bn_fold(kg, kb, km, kv, n, eps=1e-5):
        gamma = 1.0 + 0.1 * jax.random.normal(kg, (1, n), jnp.float32)
        beta = 0.1 * jax.random.normal(kb, (1, n), jnp.float32)
        running_mean = 0.1 * jax.random.normal(km, (1, n), jnp.float32)
        running_var = jnp.abs(1.0 + 0.1 * jax.random.normal(kv, (1, n), jnp.float32))
        scale = gamma / jnp.sqrt(running_var + eps)
        shift = beta - running_mean * scale
        return scale, shift

    s1, t1 = bn_fold(ks[8], ks[9], ks[10], ks[11], _H1)
    s2, t2 = bn_fold(ks[12], ks[13], ks[14], ks[15], _H2)

    return (w1, b1, s1, t1, w2, b2, s2, t2, w3, b3, wl, bl)


def reference_forward(x, params):
    """Pure-JAX reference with the ORIGINAL (unfolded) parameterization."""
    (w1, b1, s1, t1, w2, b2, s2, t2, w3, b3, wl, bl) = params
    x2d = x.reshape(x.shape[0], -1).astype(jnp.float32)
    h1 = jnp.maximum((x2d @ w1 + b1) * s1 + t1, 0.0)
    h2 = jnp.maximum((h1 @ w2 + b2) * s2 + t2, 0.0)
    mlp_out = h2 @ w3 + b3
    lin_out = x2d @ wl + bl
    return jax.nn.sigmoid(mlp_out + lin_out)


if __name__ == "__main__":
    key = jax.random.PRNGKey(0)
    k_x, k_p, k_big = jax.random.split(key, 3)

    # Small input consistent with the module: (batch, channels, features),
    # flattened to (batch, input_dim) in forward.  input_dim = 4 * 16 = 64.
    B, C, F = 8, 4, 16
    D = C * F
    x = jax.random.normal(k_x, (B, C, F), jnp.float32)
    params = init_params(k_p, D)
    ref = reference_forward(x, params)

    # f32 path (exact algebra: folding/fusion is purely algebraic).
    out = jax.block_until_ready(widedeep_forward(x, params))
    assert out.shape == (B, 1)
    assert jnp.allclose(out, ref, atol=1e-5, rtol=1e-5), (out, ref)

    # bf16-input path (x already bf16 upstream -> bf16 x / bf16 W1a in-kernel).
    out_bf16 = jax.block_until_ready(widedeep_forward(x.astype(jnp.bfloat16), params))
    assert out_bf16.shape == (B, 1)
    assert jnp.allclose(out_bf16, ref, atol=2e-2, rtol=2e-2), (out_bf16, ref)

    # Larger ragged batch: exercises the tiled grid, the masked last block and
    # the lane-dense output stores.
    Bb = 2500
    xb = jax.random.normal(k_big, (Bb, D), jnp.float32)
    refb = reference_forward(xb, params)
    outb = jax.block_until_ready(widedeep_forward(xb, params))
    assert outb.shape == (Bb, 1)
    assert jnp.allclose(outb, refb, atol=1e-5, rtol=1e-5), (outb, refb)

    print("KERNEL_OK")
</pallas_src>

<mosaic_0001>
module attributes {stable_mosaic.version = 11 : i64} {
  func.func @_widedeep_kernel(%arg0: i32, %arg1: memref<8x64xf32, #tpu.memory_space<vmem>>, %arg2: memref<33x64xf32, #tpu.memory_space<vmem>>, %arg3: memref<33x1xf32, #tpu.memory_space<vmem>>, %arg4: memref<16x32xf32, #tpu.memory_space<vmem>>, %arg5: memref<16x1xf32, #tpu.memory_space<vmem>>, %arg6: memref<1x16xf32, #tpu.memory_space<vmem>>, %arg7: memref<1x8xf32, #tpu.memory_space<vmem>>) attributes {dimension_semantics = [#tpu.dimension_semantics<parallel>], iteration_bounds = array<i64: 1>, scalar_prefetch = 0 : i64, scratch_operands = 0 : i64, tpu.core_type = #tpu.core_type<tc>, window_params = [{transform_indices = @transform_0, window_bounds = array<i64: 8, 64>}, {pipeline_mode = #tpu.pipeline_mode<synchronous>, transform_indices = @transform_1, window_bounds = array<i64: 33, 64>}, {pipeline_mode = #tpu.pipeline_mode<synchronous>, transform_indices = @transform_2, window_bounds = array<i64: 33, 1>}, {pipeline_mode = #tpu.pipeline_mode<synchronous>, transform_indices = @transform_3, window_bounds = array<i64: 16, 32>}, {pipeline_mode = #tpu.pipeline_mode<synchronous>, transform_indices = @transform_4, window_bounds = array<i64: 16, 1>}, {pipeline_mode = #tpu.pipeline_mode<synchronous>, transform_indices = @transform_5, window_bounds = array<i64: 1, 16>}, {transform_indices = @transform_6, window_bounds = array<i64: 1, 8>}]} {
    %c0 = arith.constant 0 : index
    %c0_0 = arith.constant 0 : index
    %0 = vector.load %arg1[%c0, %c0_0] : memref<8x64xf32, #tpu.memory_space<vmem>>, vector<8x64xf32>
    %c0_1 = arith.constant 0 : index
    %c0_2 = arith.constant 0 : index
    %1 = vector.load %arg2[%c0_1, %c0_2] : memref<33x64xf32, #tpu.memory_space<vmem>>, vector<33x64xf32>
    %cst = arith.constant dense<0.000000e+00> : vector<33x8xf32>
    %2 = tpu.matmul %1, %0, %cst {dimension_numbers = #tpu.dot_dimension_numbers<[1], [1], [0], [0], [0, 0, 1, 0], [], []>} : vector<33x64xf32>, vector<8x64xf32>, vector<33x8xf32> -> vector<33x8xf32>
    %c0_3 = arith.constant 0 : index
    %c0_4 = arith.constant 0 : index
    %3 = vector.load %arg3[%c0_3, %c0_4] : memref<33x1xf32, #tpu.memory_space<vmem>>, vector<33x1xf32>
    %4 = vector.broadcast %3 : vector<33x1xf32> to vector<33x8xf32>
    %5 = arith.addf %2, %4 : vector<33x8xf32>
    %6 = vector.extract_strided_slice %5 {offsets = [0, 0], sizes = [32, 8], strides = [1, 1]} : vector<33x8xf32> to vector<32x8xf32>
    %cst_5 = arith.constant 0.000000e+00 : f32
    %7 = vector.broadcast %cst_5 : f32 to vector<32x8xf32>
    %8 = arith.maximumf %6, %7 : vector<32x8xf32>
    %9 = vector.extract_strided_slice %5 {offsets = [32, 0], sizes = [1, 8], strides = [1, 1]} : vector<33x8xf32> to vector<1x8xf32>
    %c0_6 = arith.constant 0 : index
    %c0_7 = arith.constant 0 : index
    %10 = vector.load %arg4[%c0_6, %c0_7] : memref<16x32xf32, #tpu.memory_space<vmem>>, vector<16x32xf32>
    %cst_8 = arith.constant dense<0.000000e+00> : vector<16x8xf32>
    %11 = tpu.matmul %10, %8, %cst_8 {dimension_numbers = #tpu.dot_dimension_numbers<[1], [0], [0], [1], [0, 0, 1, 1], [], []>} : vector<16x32xf32>, vector<32x8xf32>, vector<16x8xf32> -> vector<16x8xf32>
    %c0_9 = arith.constant 0 : index
    %c0_10 = arith.constant 0 : index
    %12 = vector.load %arg5[%c0_9, %c0_10] : memref<16x1xf32, #tpu.memory_space<vmem>>, vector<16x1xf32>
    %13 = vector.broadcast %12 : vector<16x1xf32> to vector<16x8xf32>
    %14 = arith.addf %11, %13 : vector<16x8xf32>
    %cst_11 = arith.constant 0.000000e+00 : f32
    %15 = vector.broadcast %cst_11 : f32 to vector<16x8xf32>
    %16 = arith.maximumf %14, %15 : vector<16x8xf32>
    %c0_12 = arith.constant 0 : index
    %c0_13 = arith.constant 0 : index
    %17 = vector.load %arg6[%c0_12, %c0_13] : memref<1x16xf32, #tpu.memory_space<vmem>>, vector<1x16xf32>
    %cst_14 = arith.constant dense<0.000000e+00> : vector<1x8xf32>
    %18 = tpu.matmul %17, %16, %cst_14 {dimension_numbers = #tpu.dot_dimension_numbers<[1], [0], [0], [1], [0, 0, 1, 1], [], []>} : vector<1x16xf32>, vector<16x8xf32>, vector<1x8xf32> -> vector<1x8xf32>
    %19 = arith.addf %18, %9 : vector<1x8xf32>
    %20 = arith.negf %19 : vector<1x8xf32>
    %21 = math.exp %20 : vector<1x8xf32>
    %cst_15 = arith.constant 1.000000e+00 : f32
    %22 = vector.broadcast %cst_15 : f32 to vector<1x8xf32>
    %23 = arith.addf %22, %21 : vector<1x8xf32>
    %24 = arith.divf %22, %23 : vector<1x8xf32>
    %c0_16 = arith.constant 0 : index
    %c0_17 = arith.constant 0 : index
    %25 = vector.load %arg7[%c0_16, %c0_17] : memref<1x8xf32, #tpu.memory_space<vmem>>, vector<1x8xf32>
    tpu.vector_store %arg7[%c0_16, %c0_17], %24 {strides = array<i32>} : memref<1x8xf32, #tpu.memory_space<vmem>>, vector<1x8xf32>,
    return
  }
  func.func @transform_0(%arg0: i32) -> (i32, i32) {
    %c0_i32 = arith.constant 0 : i32
    %c0_i32_0 = arith.constant 0 : i32
    return %arg0, %c0_i32 : i32, i32
  }
  func.func @transform_1(%arg0: i32) -> (i32, i32) {
    %c0_i32 = arith.constant 0 : i32
    %c0_i32_0 = arith.constant 0 : i32
    %c0_i32_1 = arith.constant 0 : i32
    return %c0_i32, %c0_i32_0 : i32, i32
  }
  func.func @transform_2(%arg0: i32) -> (i32, i32) {
    %c0_i32 = arith.constant 0 : i32
    %c0_i32_0 = arith.constant 0 : i32
    %c0_i32_1 = arith.constant 0 : i32
    return %c0_i32, %c0_i32_0 : i32, i32
  }
  func.func @transform_3(%arg0: i32) -> (i32, i32) {
    %c0_i32 = arith.constant 0 : i32
    %c0_i32_0 = arith.constant 0 : i32
    %c0_i32_1 = arith.constant 0 : i32
    return %c0_i32, %c0_i32_0 : i32, i32
  }
  func.func @transform_4(%arg0: i32) -> (i32, i32) {
    %c0_i32 = arith.constant 0 : i32
    %c0_i32_0 = arith.constant 0 : i32
    %c0_i32_1 = arith.constant 0 : i32
    return %c0_i32, %c0_i32_0 : i32, i32
  }
  func.func @transform_5(%arg0: i32) -> (i32, i32) {
    %c0_i32 = arith.constant 0 : i32
    %c0_i32_0 = arith.constant 0 : i32
    %c0_i32_1 = arith.constant 0 : i32
    return %c0_i32, %c0_i32_0 : i32, i32
  }
  func.func @transform_6(%arg0: i32) -> (i32, i32) {
    %c0_i32 = arith.constant 0 : i32
    %c0_i32_0 = arith.constant 0 : i32
    return %c0_i32, %arg0 : i32, i32
  }
}

</mosaic_0001>

<bundles_post_ra>
// kernel: tpu_custom_call.1
= control target key start
LH: loop header
LB: loop body
LE: loop exit
PB: predicated region body
PF: predicated region fallthrough
CT: control target
= control target key end

     0   :  { %11 = vsyncpa [#allocation3], 0  ;;  %s407_s0 = inlined_call_operand.hbm [shape: f32[8,64], index: 0, kind: input, shape index: {}]   ;;  %s408_s1 = inlined_call_operand.vmem [shape: f32[33,64], index: 1, kind: input, shape index: {}]   ;;  %s409_s2 = inlined_call_operand.vmem [shape: f32[33,1], index: 2, kind: input, shape index: {}]   ;;  %s410_s3 = inlined_call_operand.vmem [shape: f32[16,32], index: 3, kind: input, shape index: {}]   ;;  %s411_s4 = inlined_call_operand.vmem [shape: f32[16,1], index: 4, kind: input, shape index: {}]   ;;  %s412_s5 = inlined_call_operand.vmem [shape: f32[1,16], index: 5, kind: input, shape index: {}]   ;;  %s413_s6 = inlined_call_operand.hbm [shape: f32[1,8], index: 6, kind: output, shape index: {}]  }
   0x1   :  { %12 = vsyncpa [#allocation4], 0  ;;  %s18_s23 = sshll.u32 %s407_s0, 4  ;;  %s311_s24 = smov [#allocation2]   ;;  %s19_s23 = int_to_ptr.hbm [resolvable:$true] %s18_s23 }
   0x2   :  { %s20_s25 = sshll.u32 %s311_s24, 4  ;;  %s21_s25 = int_to_ptr.vmem [resolvable:$true] %s20_s25 }
   0x3   :  { %23 = dma.hbm_to_vmem [thread:$0]  %s19_s23, 128, %s21_s25, [#allocation3]  }
   0x4   :  { %307 = dma.done.wait [#allocation3], 128  }
   0x5   :  { %308 = vsyncadd [#allocation3], 4294967168  ;;  %v312_v0 = vmov 0   ;;  %vm74_vm0 = vcmask 523264   ;;  %v38_v1 = vld [vmem:[#allocation2] sm:$0xff]  ;;  %v42_v3 = vld [vmem:[%s408_s1 + $0x18] sm:$0xff] }
   0x6   :  { %253 = vset.pattern.permute.xlu1 %v312_v0  ;;  %252 = vset.pattern.permute.xlu0 %v312_v0  ;;  %v39_v2 = vld [vmem:[%s408_s1] sm:$0xff]  ;;  %v47_v4 = vld [vmem:[%s409_s2 + $0x18] sm:$0xff]  ;;  %v45_v5 = vld [vmem:[%s409_s2 + $0x8] sm:$0xff]  ;;  %vm143_vm1 = vcmask 261120   ;;  %vm176_vm2 = vcmask 130048   ;;  %s228_s29 = sshll.u32 %s413_s6, 4  ;;  %s229_s29 = int_to_ptr.hbm [resolvable:$true] %s228_s29 }
   0x7   :  { %254 = vset.pattern.permute.xlu2 %v312_v0  ;;  %238 = vmatpush.xpose.msk.msra.mxu0 %vm74_vm0, %v38_v1  ;;  %v46_v6 = vld [vmem:[%s409_s2 + $0x10] sm:$0xff]  ;;  %v44_v7 = vld [vmem:[%s409_s2] sm:$0xff]  ;;  %v40_v8 = vld [vmem:[%s408_s1 + $0x8] sm:$0xff]  ;;  %vm219_vm6 = vcmask 57344  }
   0x8   :  { %248 = vmatpush.xpose.msk.msra.mxu3 %vm74_vm0, %v38_v1  ;;  %66 = vperm.xlu0 %252, %v47_v4   ;;  %v43_v9 = vld [vmem:[%s408_s1 + $0x20] sm:$0x1]  ;;  %v41_v11 = vld [vmem:[%s408_s1 + $0x10] sm:$0xff]  ;;  %v132_v13 = vld [vmem:[%s411_s4 + $0x8] sm:$0xff] }
   0x9   :  { %56 = vperm.xlu1 %253, %v45_v5   ;;  %v48_v10 = vld [vmem:[%s409_s2 + $0x20] sm:$0x1]  ;;  %140 = vperm.xlu2 %254, %v132_v13   ;;  %v130_v31 = vld [vmem:[%s410_s3 + $0x8] sm:$0xff] }
   0xa   :  { %239 = vmatmul.msk.f32.vlgmr.msra.gmra.mxu0 %vm74_vm0, %v39_v2  ;;  %v131_v19 = vld [vmem:[%s411_s4] sm:$0xff] }
   0xb   :  { %242 = vmatmul.msk.f32.vlgmr.msra.gmra.mxu3 %vm74_vm0, %v42_v3  ;;  %v129_v30 = vld [vmem:[%s410_s3] sm:$0xff]  ;;  %s313_s3 = smov [#allocation5]  }
   0xc   :  { %v175_v40 = vld [vmem:[%s412_s5] sm:$0x1]  ;;  %s226_s5 = sshll.u32 %s313_s3, 4  ;;  %s227_s5 = int_to_ptr.vmem [resolvable:$true] %s226_s5 }
  0x10   :  { %61 = vperm.xlu0 %252, %v46_v6  }
  0x11   :  { %51 = vperm.xlu1 %253, %v44_v7   ;;  %135 = vperm.xlu2 %254, %v131_v19  }
  0x12   :  { %240 = vmatmul.msk.f32.gmra.mxu0 %vm74_vm0, %v40_v8 }
  0x13   :  { %243 = vmatmul.msk.f32.gmra.mxu3 %vm74_vm0, %v43_v9 }
  0x18   :  { %71 = vperm.xlu0 %252, %v48_v10  }
  0x1a   :  { %241 = vmatmul.msk.f32.gmra.mxu0 %vm74_vm0, %v41_v11 }
  0x63   :  { %v141_v32 = vpop.permute.xlu2 %140 }
  0x6b   :  { %v136_v34 = vpop.permute.xlu2 %135 }
  0x7a   :  { %v67_v14 = vpop.permute.xlu0 %66 }
  0x7b   :  { %v57_v15 = vpop.permute.xlu1 %56 }
  0x82   :  { %v62_v21 = vpop.permute.xlu0 %61 }
  0x83   :  { %v52_v22 = vpop.permute.xlu1 %51 }
  0x87   :  { %v110_v12 = vpop.f32.mrf.mxu0 }
  0x88   :  { %v111_v26 = vadd.f32 %v110_v12, %v52_v22 }
  0x8a   :  { %v125_v29 = vmax.f32 %v111_v26, 0.0  ;;  %v72_v42 = vpop.permute.xlu0 %71 }
  0x8e   :  { %v119_v16 = vpop.f32.mrf.mxu3 }
  0x8f   :  { %v120_v17 = vadd.f32 %v119_v16, %v67_v14  ;;  %v113_v18 = vpop.f32.mrf.mxu0 }
  0x90   :  { %v114_v24 = vadd.f32 %v113_v18, %v57_v15 }
  0x91   :  { %v128_v20 = vmax.f32 %v120_v17, 0.0 }
  0x92   :  { %v126_v28 = vmax.f32 %v114_v24, 0.0 }
  0x93   :  { %162 = vmatpush.msra.mxu1 %v128_v20 }
  0x96   :  { %v122_v41 = vpop.f32.mrf.mxu3 }
  0x97   :  { %v116_v23 = vpop.f32.mrf.mxu0  ;;  %v123_v43 = vadd.f32 %v122_v41, %v72_v42 }
  0x98   :  { %v117_v25 = vadd.f32 %v116_v23, %v62_v21 }
  0x9a   :  { %v127_v27 = vmax.f32 %v117_v25, 0.0 }
  0x9c   :  { %163 = vmatpush.msra.mxu1 %v127_v27 }
  0x9e   :  { %164 = vmatpush.msra.mxu1 %v126_v28 }
  0xa0   :  { %165 = vmatpush.msra.mxu1 %v125_v29 }
  0xa1   :  { %244 = vmatmul.msk.f32.vlgmr.msra.gmra.mxu1 %vm143_vm1, %v129_v30 }
  0xa9   :  { %245 = vmatmul.msk.f32.gmra.mxu1 %vm143_vm1, %v130_v31 }
 0x11e   :  { %v167_v33 = vpop.f32.mrf.mxu1 }
 0x11f   :  { %v168_v36 = vadd.f32 %v167_v33, %v136_v34 }
 0x121   :  { %v173_v39 = vmax.f32 %v168_v36, 0.0 }
 0x126   :  { %v170_v35 = vpop.f32.mrf.mxu1 }
 0x127   :  { %v171_v37 = vadd.f32 %v170_v35, %v141_v32 }
 0x129   :  { %v174_v38 = vmax.f32 %v171_v37, 0.0 }
 0x12b   :  { %194 = vmatpush.msra.mxu2 %v174_v38 }
 0x12d   :  { %195 = vmatpush.msra.mxu2 %v173_v39 }
 0x12e   :  { %246 = vmatmul.msk.f32.vlgmr.msra.gmra.mxu2 %vm176_vm2, %v175_v40 }
 0x1b1   :  { %v197_v44 = vpop.f32.mrf.mxu2 }
 0x1b2   :  { %v198_v45 = vadd.f32 %v197_v44, %v123_v43 }
 0x1b4   :  { %v247_v46 = vmul.f32 -1.442695, %v198_v45 }
 0x1b6   :  { %255 = vpow2.f32 %v247_v46 }
 0x1bc   :  { %v256_v47 = vpop.eup %255 }
 0x1bd   :  { %v203_v48 = vadd.f32 1.0, %v256_v47 }
 0x1bf   :  { %257 = vrcp.f32 %v203_v48  ;;  %v215_v52 = vand.u32 2147483648, %v203_v48  ;;  %v213_v54 = vand.u32 2147483647, %v203_v48  ;;  %vm209_vm4 = vweird.f32 %v203_v48 }
 0x1c1   :  { %v216_v56 = vor.u32 1.1754944e-38, %v215_v52  ;;  %vm214_vm7 = vcmp.eq.f32.partialorder %v213_v54, 8.507059e+37 }
 0x1c5   :  { %v258_v49 = vpop.eup %257 }
 0x1c6   :  { %v205_v50 = vmul.f32 %v258_v49, %v203_v48  ;;  %vm210_vm3 = vweird.f32 %v258_v49 }
 0x1c7   :  { %vm211_vm5 = vmor %vm209_vm4, %vm210_vm3 }
 0x1c8   :  { %v206_v51 = vsub.f32 1.0, %v205_v50 }
 0x1ca   :  { %v207_v53 = vmul.f32 %v258_v49, %v206_v51 }
 0x1cc   :  { %v208_v55 = vadd.f32 %v258_v49, %v207_v53 }
 0x1ce   :  { %v212_v57 = vsel %vm211_vm5, %v258_v49, %v208_v55 }
 0x1cf   :  { %v217_v58 = vsel %vm214_vm7, %v216_v56, %v212_v57 }
 0x1d0   :  { %220 = vst.msk [vmem:[#allocation5] sm:$0x1] %vm219_vm6, %v217_v58 }
 0x1d1   :  { %231 = dma.vmem_to_hbm [thread:$0]  %s227_s5, 16, %s229_s29, [#allocation4]  }
 0x1d2   :  { %309 = dma.done.wait [#allocation4], 16  }
 0x1d3   :  { %310 = vsyncadd [#allocation4], 4294967280 }
 0x1d4   :  { %236 = vsyncpa [#allocation3], 1 }
 0x1d5   :  { %237 = vsyncpa [#allocation4], 1 }

</bundles_post_ra>
